<compile_context>
chip_gen: v7x
topology: tpu7x:2x2x1
jax: 0.10.0
libtpu: 0.0.40
codegen_flags: <defaults>
</compile_context>

<pallas_src>
import math

import jax
import jax.numpy as jnp
from jax.experimental import pallas as pl
from jax.experimental.pallas import tpu as pltpu


_LANES = 128
_SUBLANES = 8
_TARGET_OUT_TILE_BYTES = 3 << 20   # aim for a few-MiB output tile per grid step
_MAX_EMB_TILE_BYTES = 4 << 20      # keep resident embedding tile bounded (VMEM independent of V)
_MAX_GROUPS = 8                    # cap VPU cost of the in-kernel lane expansion (2*groups ops/elem)
_MIN_PALLAS_OUT_BYTES = 1 << 20    # below this, a fused XLA broadcast-mul is strictly faster


def _round_up(v, m):
    return (v + m - 1) // m * m


def _pick_groups(V, D):
    """# vocab entries packed per stored row so the lane width groups*D is a multiple of 128."""
    if D % _LANES == 0:
        return 1
    g = _LANES // math.gcd(D, _LANES)
    if g <= _MAX_GROUPS and V % g == 0:
        return g
    return 1  # natural layout fallback (masked stores, still correct)


def _pick_vocab_tile(n_g, row_bytes):
    """Largest multiple-of-8 divisor of n_g whose embedding tile fits the cap (or full n_g)."""
    if n_g * row_bytes <= _MAX_EMB_TILE_BYTES:
        return n_g
    best = n_g
    t = _SUBLANES
    while t < n_g:
        if n_g % t == 0 and t * row_bytes <= _MAX_EMB_TILE_BYTES:
            best = t
        t += _SUBLANES
    return best


def _pick_batch_tile(B, row_bytes):
    tb = max(1, _TARGET_OUT_TILE_BYTES // max(row_bytes, 1))
    if tb >= B:
        return B
    tb = max(_SUBLANES, tb - tb % _SUBLANES)
    while tb > _SUBLANES and B % tb != 0:
        tb -= _SUBLANES
    if B % tb != 0:
        return B
    return tb


def _make_kernel(groups, d_model):
    gd = groups * d_model

    def kernel(x_ref, emb_ref, out_ref):
        # x_ref:   (TB, TG, groups)
        # emb_ref: (TG, groups * D)
        # out_ref: (TB, TG, groups * D)   <- lane-dense when groups*D % 128 == 0
        emb = emb_ref[...][None, :, :]                       # (1, TG, GD)
        x = x_ref[...]                                       # (TB, TG, groups)
        if groups == 1:
            out = emb * x                                    # (TB, TG, 1) broadcast over lanes
        else:
            lane = jax.lax.broadcasted_iota(jnp.int32, (1, 1, gd), 2)
            out = None
            for g in range(groups):
                mask = jnp.logical_and(lane >= g * d_model, lane < (g + 1) * d_model)
                emb_g = jnp.where(mask, emb, 0.0)            # tiny (1, TG, GD) side work
                term = emb_g * x[:, :, g:g + 1]              # (TB, TG, GD), exact (one hot group)
                out = term if out is None else out + term
        out_ref[...] = out.astype(out_ref.dtype)

    return kernel


def cond_embedding_forward(x, embeddings, *, force_pallas=False):
    """x: (B, V), embeddings: (1, V, D) -> (B, V, D)."""
    B, V = x.shape
    one, Ve, D = embeddings.shape
    assert one == 1 and Ve == V
    out_dtype = jnp.result_type(x.dtype, embeddings.dtype)
    itemsize = jnp.dtype(out_dtype).itemsize
    out_bytes = B * V * D * itemsize

    # Tiny problems: launch/DMA overhead dwarfs ~KiB of work; let XLA fuse it.
    if not force_pallas and out_bytes < _MIN_PALLAS_OUT_BYTES:
        return (embeddings * x[:, :, None]).astype(out_dtype)

    groups = _pick_groups(V, D)
    gd = groups * D                       # stored lane width
    n_g = V // groups                     # vocab rows after grouping

    tg = _pick_vocab_tile(n_g, gd * itemsize)
    tb = _pick_batch_tile(B, tg * gd * itemsize)
    n_gt, n_bt = n_g // tg, B // tb
    # v7x has 2 TensorCores: keep >= 2 steps on the parallel batch axis when it is free to do so.
    if n_gt * n_bt == 1 and B % (2 * _SUBLANES) == 0:
        tb = B // 2
        n_bt = 2

    # Pure row-major reshapes (no data movement of note).
    x_g = x.reshape(B, n_g, groups)
    emb_g = embeddings.reshape(n_g, gd)

    kernel = _make_kernel(groups, D)

    cost = pl.CostEstimate(
        flops=B * V * D,
        transcendentals=0,
        bytes_accessed=(B * V * D + V * D + B * V) * itemsize,
    )

    def _block_bytes(*shape):
        *lead, s, l = shape
        n = 1
        for d_ in lead:
            n *= d_
        return n * _round_up(s, _SUBLANES) * _round_up(l, _LANES) * itemsize

    def build(emb_buffers):
        emb_kwargs = {}
        n_emb_buf = 2
        if emb_buffers is not None:
            emb_kwargs["pipeline_mode"] = pl.Buffered(emb_buffers)
            n_emb_buf = emb_buffers
        vmem_est = (2 * _block_bytes(tb, tg, groups)       # x blocks (lane padded)
                    + n_emb_buf * _block_bytes(tg, gd)     # embedding tile(s)
                    + 2 * _block_bytes(tb, tg, gd)         # output blocks
                    + 2 * _block_bytes(tb, tg, gd))        # compute intermediates headroom
        vmem_limit = int(min(max(vmem_est * 5 // 4, 16 << 20), 64 << 20))

        grid_spec = pltpu.PrefetchScalarGridSpec(
            num_scalar_prefetch=0,
            grid=(n_gt, n_bt),                             # vocab outer, batch inner => emb reuse
            in_specs=[
                pl.BlockSpec((tb, tg, groups), lambda gt, bt: (bt, gt, 0)),
                pl.BlockSpec((tg, gd), lambda gt, bt: (gt, 0), **emb_kwargs),
            ],
            out_specs=pl.BlockSpec((tb, tg, gd), lambda gt, bt: (bt, gt, 0)),
        )
        return pl.pallas_call(
            kernel,
            out_shape=jax.ShapeDtypeStruct((B, n_g, gd), out_dtype),
            grid_spec=grid_spec,
            compiler_params=pltpu.CompilerParams(
                dimension_semantics=("parallel", "parallel"),
                vmem_limit_bytes=vmem_limit,
            ),
            cost_estimate=cost,
        )(x_g, emb_g)

    try:
        # Embedding tile index is constant along the inner batch axis -> single-buffer it.
        out_g = build(1)
    except Exception:  # pragma: no cover - fall back to default double-buffering if rejected.
        out_g = build(None)

    return out_g.reshape(B, V, D)


if __name__ == "__main__":
    key = jax.random.PRNGKey(0)
    k1, k2, k3, k4 = jax.random.split(key, 4)

    def reference(xv, emb):
        return emb * xv[:, :, None]

    # Case 1: module's toy shapes (batch=2, num_vocab=8, d_model=32) -> grouped lane-dense path.
    emb1 = 0.02 * jax.random.normal(k1, (1, 8, 32), dtype=jnp.float32)
    x1 = jax.random.normal(k2, (2, 8), dtype=jnp.float32)
    out1 = jax.block_until_ready(cond_embedding_forward(x1, emb1, force_pallas=True))
    assert out1.shape == (2, 8, 32)
    assert jnp.allclose(out1, reference(x1, emb1), atol=1e-6, rtol=1e-6)

    # Auto path for tiny problems (feedback item: bypass Pallas below a size threshold).
    out1_auto = jax.block_until_ready(cond_embedding_forward(x1, emb1))
    assert jnp.allclose(out1_auto, reference(x1, emb1), atol=1e-6, rtol=1e-6)

    # Case 2: exercises the D % 128 == 0 branch, batch tiling, and a multi-step parallel grid.
    emb2 = 0.02 * jax.random.normal(k3, (1, 8, 128), dtype=jnp.float32)
    x2 = jax.random.normal(k4, (64, 8), dtype=jnp.float32)
    out2 = jax.block_until_ready(cond_embedding_forward(x2, emb2, force_pallas=True))
    assert out2.shape == (64, 8, 128)
    assert jnp.allclose(out2, reference(x2, emb2), atol=1e-6, rtol=1e-6)

    print("KERNEL_OK")
</pallas_src>

<mosaic_0001>
module attributes {stable_mosaic.version = 11 : i64} {
  func.func @kernel(%arg0: i32, %arg1: i32, %arg2: memref<2x2x4xf32, #tpu.memory_space<vmem>>, %arg3: memref<2x128xf32, #tpu.memory_space<vmem>>, %arg4: memref<2x2x128xf32, #tpu.memory_space<vmem>>) attributes {dimension_semantics = [#tpu.dimension_semantics<parallel>, #tpu.dimension_semantics<parallel>], iteration_bounds = array<i64: 1, 1>, scalar_prefetch = 0 : i64, scratch_operands = 0 : i64, tpu.core_type = #tpu.core_type<tc>, window_params = [{transform_indices = @transform_0, window_bounds = array<i64: 2, 2, 4>}, {pipeline_mode = #tpu.pipeline_mode<synchronous>, transform_indices = @transform_1, window_bounds = array<i64: 2, 128>}, {transform_indices = @transform_2, window_bounds = array<i64: 2, 2, 128>}]} {
    %c0 = arith.constant 0 : index
    %c0_0 = arith.constant 0 : index
    %0 = vector.load %arg3[%c0, %c0_0] : memref<2x128xf32, #tpu.memory_space<vmem>>, vector<2x128xf32>
    %1 = vector.shape_cast %0 : vector<2x128xf32> to vector<1x2x128xf32>
    %c0_1 = arith.constant 0 : index
    %c0_2 = arith.constant 0 : index
    %c0_3 = arith.constant 0 : index
    %2 = vector.load %arg2[%c0_1, %c0_2, %c0_3] : memref<2x2x4xf32, #tpu.memory_space<vmem>>, vector<2x2x4xf32>
    %3 = tpu.iota {dimensions = array<i32: 2>} : vector<1x1x128xi32>
    %c0_i32 = arith.constant 0 : i32
    %4 = vector.broadcast %c0_i32 : i32 to vector<1x1x128xi32>
    %5 = arith.cmpi sge, %3, %4 : vector<1x1x128xi32>
    %c32_i32 = arith.constant 32 : i32
    %6 = vector.broadcast %c32_i32 : i32 to vector<1x1x128xi32>
    %7 = arith.cmpi slt, %3, %6 : vector<1x1x128xi32>
    %8 = arith.andi %5, %7 : vector<1x1x128xi1>
    %cst = arith.constant 0.000000e+00 : f32
    %9 = vector.shape_cast %8 : vector<1x1x128xi1> to vector<1x1x128xi1>
    %10 = vector.broadcast %9 : vector<1x1x128xi1> to vector<1x2x128xi1>
    %11 = vector.broadcast %cst : f32 to vector<1x2x128xf32>
    %12 = arith.select %10, %1, %11 : vector<1x2x128xi1>, vector<1x2x128xf32>
    %13 = vector.extract_strided_slice %2 {offsets = [0, 0, 0], sizes = [2, 2, 1], strides = [1, 1, 1]} : vector<2x2x4xf32> to vector<2x2x1xf32>
    %14 = vector.broadcast %12 : vector<1x2x128xf32> to vector<2x2x128xf32>
    %15 = vector.broadcast %13 : vector<2x2x1xf32> to vector<2x2x128xf32>
    %16 = arith.mulf %14, %15 : vector<2x2x128xf32>
    %c32_i32_4 = arith.constant 32 : i32
    %17 = vector.broadcast %c32_i32_4 : i32 to vector<1x1x128xi32>
    %18 = arith.cmpi sge, %3, %17 : vector<1x1x128xi32>
    %c64_i32 = arith.constant 64 : i32
    %19 = vector.broadcast %c64_i32 : i32 to vector<1x1x128xi32>
    %20 = arith.cmpi slt, %3, %19 : vector<1x1x128xi32>
    %21 = arith.andi %18, %20 : vector<1x1x128xi1>
    %cst_5 = arith.constant 0.000000e+00 : f32
    %22 = vector.shape_cast %21 : vector<1x1x128xi1> to vector<1x1x128xi1>
    %23 = vector.broadcast %22 : vector<1x1x128xi1> to vector<1x2x128xi1>
    %24 = vector.broadcast %cst_5 : f32 to vector<1x2x128xf32>
    %25 = arith.select %23, %1, %24 : vector<1x2x128xi1>, vector<1x2x128xf32>
    %26 = vector.extract_strided_slice %2 {offsets = [0, 0, 1], sizes = [2, 2, 1], strides = [1, 1, 1]} : vector<2x2x4xf32> to vector<2x2x1xf32>
    %27 = vector.broadcast %25 : vector<1x2x128xf32> to vector<2x2x128xf32>
    %28 = vector.broadcast %26 : vector<2x2x1xf32> to vector<2x2x128xf32>
    %29 = arith.mulf %27, %28 : vector<2x2x128xf32>
    %30 = arith.addf %16, %29 : vector<2x2x128xf32>
    %c64_i32_6 = arith.constant 64 : i32
    %31 = vector.broadcast %c64_i32_6 : i32 to vector<1x1x128xi32>
    %32 = arith.cmpi sge, %3, %31 : vector<1x1x128xi32>
    %c96_i32 = arith.constant 96 : i32
    %33 = vector.broadcast %c96_i32 : i32 to vector<1x1x128xi32>
    %34 = arith.cmpi slt, %3, %33 : vector<1x1x128xi32>
    %35 = arith.andi %32, %34 : vector<1x1x128xi1>
    %cst_7 = arith.constant 0.000000e+00 : f32
    %36 = vector.shape_cast %35 : vector<1x1x128xi1> to vector<1x1x128xi1>
    %37 = vector.broadcast %36 : vector<1x1x128xi1> to vector<1x2x128xi1>
    %38 = vector.broadcast %cst_7 : f32 to vector<1x2x128xf32>
    %39 = arith.select %37, %1, %38 : vector<1x2x128xi1>, vector<1x2x128xf32>
    %40 = vector.extract_strided_slice %2 {offsets = [0, 0, 2], sizes = [2, 2, 1], strides = [1, 1, 1]} : vector<2x2x4xf32> to vector<2x2x1xf32>
    %41 = vector.broadcast %39 : vector<1x2x128xf32> to vector<2x2x128xf32>
    %42 = vector.broadcast %40 : vector<2x2x1xf32> to vector<2x2x128xf32>
    %43 = arith.mulf %41, %42 : vector<2x2x128xf32>
    %44 = arith.addf %30, %43 : vector<2x2x128xf32>
    %c96_i32_8 = arith.constant 96 : i32
    %45 = vector.broadcast %c96_i32_8 : i32 to vector<1x1x128xi32>
    %46 = arith.cmpi sge, %3, %45 : vector<1x1x128xi32>
    %c128_i32 = arith.constant 128 : i32
    %47 = vector.broadcast %c128_i32 : i32 to vector<1x1x128xi32>
    %48 = arith.cmpi slt, %3, %47 : vector<1x1x128xi32>
    %49 = arith.andi %46, %48 : vector<1x1x128xi1>
    %cst_9 = arith.constant 0.000000e+00 : f32
    %50 = vector.shape_cast %49 : vector<1x1x128xi1> to vector<1x1x128xi1>
    %51 = vector.broadcast %50 : vector<1x1x128xi1> to vector<1x2x128xi1>
    %52 = vector.broadcast %cst_9 : f32 to vector<1x2x128xf32>
    %53 = arith.select %51, %1, %52 : vector<1x2x128xi1>, vector<1x2x128xf32>
    %54 = vector.extract_strided_slice %2 {offsets = [0, 0, 3], sizes = [2, 2, 1], strides = [1, 1, 1]} : vector<2x2x4xf32> to vector<2x2x1xf32>
    %55 = vector.broadcast %53 : vector<1x2x128xf32> to vector<2x2x128xf32>
    %56 = vector.broadcast %54 : vector<2x2x1xf32> to vector<2x2x128xf32>
    %57 = arith.mulf %55, %56 : vector<2x2x128xf32>
    %58 = arith.addf %44, %57 : vector<2x2x128xf32>
    %c0_10 = arith.constant 0 : index
    %c0_11 = arith.constant 0 : index
    %c0_12 = arith.constant 0 : index
    %59 = vector.load %arg4[%c0_10, %c0_11, %c0_12] : memref<2x2x128xf32, #tpu.memory_space<vmem>>, vector<2x2x128xf32>
    tpu.vector_store %arg4[%c0_10, %c0_11, %c0_12], %58 {strides = array<i32>} : memref<2x2x128xf32, #tpu.memory_space<vmem>>, vector<2x2x128xf32>,
    return
  }
  func.func @transform_0(%arg0: i32, %arg1: i32) -> (i32, i32, i32) {
    %c0_i32 = arith.constant 0 : i32
    %c0_i32_0 = arith.constant 0 : i32
    return %arg1, %arg0, %c0_i32 : i32, i32, i32
  }
  func.func @transform_1(%arg0: i32, %arg1: i32) -> (i32, i32) {
    %c0_i32 = arith.constant 0 : i32
    %c0_i32_0 = arith.constant 0 : i32
    return %arg0, %c0_i32 : i32, i32
  }
  func.func @transform_2(%arg0: i32, %arg1: i32) -> (i32, i32, i32) {
    %c0_i32 = arith.constant 0 : i32
    %c0_i32_0 = arith.constant 0 : i32
    return %arg1, %arg0, %c0_i32 : i32, i32, i32
  }
}

module attributes {stable_mosaic.version = 11 : i64} {
  func.func @kernel(%arg0: i32, %arg1: i32, %arg2: memref<2x2x4xf32, #tpu.memory_space<vmem>>, %arg3: memref<2x128xf32, #tpu.memory_space<vmem>>, %arg4: memref<2x2x128xf32, #tpu.memory_space<vmem>>) attributes {dimension_semantics = [#tpu.dimension_semantics<parallel>, #tpu.dimension_semantics<parallel>], iteration_bounds = array<i64: 1, 1>, scalar_prefetch = 0 : i64, scratch_operands = 0 : i64, tpu.core_type = #tpu.core_type<tc>, window_params = [{transform_indices = @transform_0, window_bounds = array<i64: 2, 2, 4>}, {transform_indices = @transform_1, window_bounds = array<i64: 2, 128>}, {transform_indices = @transform_2, window_bounds = array<i64: 2, 2, 128>}]} {
    %c0 = arith.constant 0 : index
    %c0_0 = arith.constant 0 : index
    %0 = vector.load %arg3[%c0, %c0_0] : memref<2x128xf32, #tpu.memory_space<vmem>>, vector<2x128xf32>
    %1 = vector.shape_cast %0 : vector<2x128xf32> to vector<1x2x128xf32>
    %c0_1 = arith.constant 0 : index
    %c0_2 = arith.constant 0 : index
    %c0_3 = arith.constant 0 : index
    %2 = vector.load %arg2[%c0_1, %c0_2, %c0_3] : memref<2x2x4xf32, #tpu.memory_space<vmem>>, vector<2x2x4xf32>
    %3 = tpu.iota {dimensions = array<i32: 2>} : vector<1x1x128xi32>
    %c0_i32 = arith.constant 0 : i32
    %4 = vector.broadcast %c0_i32 : i32 to vector<1x1x128xi32>
    %5 = arith.cmpi sge, %3, %4 : vector<1x1x128xi32>
    %c32_i32 = arith.constant 32 : i32
    %6 = vector.broadcast %c32_i32 : i32 to vector<1x1x128xi32>
    %7 = arith.cmpi slt, %3, %6 : vector<1x1x128xi32>
    %8 = arith.andi %5, %7 : vector<1x1x128xi1>
    %cst = arith.constant 0.000000e+00 : f32
    %9 = vector.shape_cast %8 : vector<1x1x128xi1> to vector<1x1x128xi1>
    %10 = vector.broadcast %9 : vector<1x1x128xi1> to vector<1x2x128xi1>
    %11 = vector.broadcast %cst : f32 to vector<1x2x128xf32>
    %12 = arith.select %10, %1, %11 : vector<1x2x128xi1>, vector<1x2x128xf32>
    %13 = vector.extract_strided_slice %2 {offsets = [0, 0, 0], sizes = [2, 2, 1], strides = [1, 1, 1]} : vector<2x2x4xf32> to vector<2x2x1xf32>
    %14 = vector.broadcast %12 : vector<1x2x128xf32> to vector<2x2x128xf32>
    %15 = vector.broadcast %13 : vector<2x2x1xf32> to vector<2x2x128xf32>
    %16 = arith.mulf %14, %15 : vector<2x2x128xf32>
    %c32_i32_4 = arith.constant 32 : i32
    %17 = vector.broadcast %c32_i32_4 : i32 to vector<1x1x128xi32>
    %18 = arith.cmpi sge, %3, %17 : vector<1x1x128xi32>
    %c64_i32 = arith.constant 64 : i32
    %19 = vector.broadcast %c64_i32 : i32 to vector<1x1x128xi32>
    %20 = arith.cmpi slt, %3, %19 : vector<1x1x128xi32>
    %21 = arith.andi %18, %20 : vector<1x1x128xi1>
    %cst_5 = arith.constant 0.000000e+00 : f32
    %22 = vector.shape_cast %21 : vector<1x1x128xi1> to vector<1x1x128xi1>
    %23 = vector.broadcast %22 : vector<1x1x128xi1> to vector<1x2x128xi1>
    %24 = vector.broadcast %cst_5 : f32 to vector<1x2x128xf32>
    %25 = arith.select %23, %1, %24 : vector<1x2x128xi1>, vector<1x2x128xf32>
    %26 = vector.extract_strided_slice %2 {offsets = [0, 0, 1], sizes = [2, 2, 1], strides = [1, 1, 1]} : vector<2x2x4xf32> to vector<2x2x1xf32>
    %27 = vector.broadcast %25 : vector<1x2x128xf32> to vector<2x2x128xf32>
    %28 = vector.broadcast %26 : vector<2x2x1xf32> to vector<2x2x128xf32>
    %29 = arith.mulf %27, %28 : vector<2x2x128xf32>
    %30 = arith.addf %16, %29 : vector<2x2x128xf32>
    %c64_i32_6 = arith.constant 64 : i32
    %31 = vector.broadcast %c64_i32_6 : i32 to vector<1x1x128xi32>
    %32 = arith.cmpi sge, %3, %31 : vector<1x1x128xi32>
    %c96_i32 = arith.constant 96 : i32
    %33 = vector.broadcast %c96_i32 : i32 to vector<1x1x128xi32>
    %34 = arith.cmpi slt, %3, %33 : vector<1x1x128xi32>
    %35 = arith.andi %32, %34 : vector<1x1x128xi1>
    %cst_7 = arith.constant 0.000000e+00 : f32
    %36 = vector.shape_cast %35 : vector<1x1x128xi1> to vector<1x1x128xi1>
    %37 = vector.broadcast %36 : vector<1x1x128xi1> to vector<1x2x128xi1>
    %38 = vector.broadcast %cst_7 : f32 to vector<1x2x128xf32>
    %39 = arith.select %37, %1, %38 : vector<1x2x128xi1>, vector<1x2x128xf32>
    %40 = vector.extract_strided_slice %2 {offsets = [0, 0, 2], sizes = [2, 2, 1], strides = [1, 1, 1]} : vector<2x2x4xf32> to vector<2x2x1xf32>
    %41 = vector.broadcast %39 : vector<1x2x128xf32> to vector<2x2x128xf32>
    %42 = vector.broadcast %40 : vector<2x2x1xf32> to vector<2x2x128xf32>
    %43 = arith.mulf %41, %42 : vector<2x2x128xf32>
    %44 = arith.addf %30, %43 : vector<2x2x128xf32>
    %c96_i32_8 = arith.constant 96 : i32
    %45 = vector.broadcast %c96_i32_8 : i32 to vector<1x1x128xi32>
    %46 = arith.cmpi sge, %3, %45 : vector<1x1x128xi32>
    %c128_i32 = arith.constant 128 : i32
    %47 = vector.broadcast %c128_i32 : i32 to vector<1x1x128xi32>
    %48 = arith.cmpi slt, %3, %47 : vector<1x1x128xi32>
    %49 = arith.andi %46, %48 : vector<1x1x128xi1>
    %cst_9 = arith.constant 0.000000e+00 : f32
    %50 = vector.shape_cast %49 : vector<1x1x128xi1> to vector<1x1x128xi1>
    %51 = vector.broadcast %50 : vector<1x1x128xi1> to vector<1x2x128xi1>
    %52 = vector.broadcast %cst_9 : f32 to vector<1x2x128xf32>
    %53 = arith.select %51, %1, %52 : vector<1x2x128xi1>, vector<1x2x128xf32>
    %54 = vector.extract_strided_slice %2 {offsets = [0, 0, 3], sizes = [2, 2, 1], strides = [1, 1, 1]} : vector<2x2x4xf32> to vector<2x2x1xf32>
    %55 = vector.broadcast %53 : vector<1x2x128xf32> to vector<2x2x128xf32>
    %56 = vector.broadcast %54 : vector<2x2x1xf32> to vector<2x2x128xf32>
    %57 = arith.mulf %55, %56 : vector<2x2x128xf32>
    %58 = arith.addf %44, %57 : vector<2x2x128xf32>
    %c0_10 = arith.constant 0 : index
    %c0_11 = arith.constant 0 : index
    %c0_12 = arith.constant 0 : index
    %59 = vector.load %arg4[%c0_10, %c0_11, %c0_12] : memref<2x2x128xf32, #tpu.memory_space<vmem>>, vector<2x2x128xf32>
    tpu.vector_store %arg4[%c0_10, %c0_11, %c0_12], %58 {strides = array<i32>} : memref<2x2x128xf32, #tpu.memory_space<vmem>>, vector<2x2x128xf32>,
    return
  }
  func.func @transform_0(%arg0: i32, %arg1: i32) -> (i32, i32, i32) {
    %c0_i32 = arith.constant 0 : i32
    %c0_i32_0 = arith.constant 0 : i32
    return %arg1, %arg0, %c0_i32 : i32, i32, i32
  }
  func.func @transform_1(%arg0: i32, %arg1: i32) -> (i32, i32) {
    %c0_i32 = arith.constant 0 : i32
    %c0_i32_0 = arith.constant 0 : i32
    return %arg0, %c0_i32 : i32, i32
  }
  func.func @transform_2(%arg0: i32, %arg1: i32) -> (i32, i32, i32) {
    %c0_i32 = arith.constant 0 : i32
    %c0_i32_0 = arith.constant 0 : i32
    return %arg1, %arg0, %c0_i32 : i32, i32, i32
  }
}

</mosaic_0001>

<bundles_post_ra>
// kernel: tpu_custom_call.1
= control target key start
LH: loop header
LB: loop body
LE: loop exit
PB: predicated region body
PF: predicated region fallthrough
CT: control target
= control target key end

     0   :  { %7 = vsyncpa [#allocation3], 0  ;;  %s240_s0 = inlined_call_operand.hbm [shape: f32[2,2,4], index: 0, kind: input, shape index: {}]   ;;  %s241_s1 = inlined_call_operand.vmem [shape: f32[2,128], index: 1, kind: input, shape index: {}]   ;;  %s242_s2 = inlined_call_operand.hbm [shape: f32[2,2,128], index: 2, kind: output, shape index: {}]  }
   0x1   :  { %8 = vsyncpa [#allocation4], 0  ;;  %s184_s9 = smov [#allocation2]   ;;  %s136_s13 = scalar_lea.hbm %s240_s0, 64 }
   0x2   :  { %s14_s10 = sshll.u32 %s184_s9, 4  ;;  %p137_p0 = scmp.ne.s32.totalorder %s240_s0, %s136_s13  ;;  %s15_s10 = int_to_ptr.vmem [resolvable:$true] %s14_s10 }
   0x3   :  { %p140_p1 = scmp.lt.u32.totalorder %s136_s13, %s240_s0 }
   0x5   :  { %p142_p2 = pnand %p140_p1, %p137_p0 }
   0x7   :  { %145 = shalt.err (!%p142_p2)
}
   0x8   :  { %s146_s18 = scalar_lea.vmem %s15_s10, 64  ;;  %p151_p4 = scmp.lt.s32.totalorder %s15_s10, %s15_s10 }
   0x9   :  { %p147_p3 = scmp.ne.s32.totalorder %s15_s10, %s146_s18  ;;  %p152_p5 = scmp.lt.s32.totalorder %s146_s18, %s146_s18 }
   0xb   :  { %p153_p6 = por %p152_p5, %p151_p4 }
   0xd   :  { %p154_p7 = pnand %p153_p6, %p147_p3 }
   0xf   :  { %157 = shalt.err (!%p154_p7)
}
  0x10   :  { %s185_s19 = smov 32   ;;  %s186_s20 = smov 2  }
  0x11   :  { %20 = dma.hbm_to_vmem [thread:$0]  %s240_s0, 64, %s15_s10, [#allocation3], %s185_s19, %s185_s19, %s186_s20  }
  0x12   :  { %180 = dma.done.wait [#allocation3], 64  }
  0x13   :  { %181 = vsyncadd [#allocation3], 4294967232  ;;  %v187_v0 = vmov 1   ;;  %v188_v1 = vmov 0   ;;  %v27_v2 = vld [vmem:[#allocation2] sm:$0x3]  ;;  %v29_v6 = vlaneseq }
  0x14   :  { %131 = vset.pattern.permute.xlu1 %v187_v0  ;;  %130 = vset.pattern.permute.xlu0 %v188_v1  ;;  %v28_v3 = vld [vmem:[#allocation2 + $0x2] sm:$0x3]  ;;  %v189_v4 = vmov 2   ;;  %v190_v5 = vmov 3   ;;  %v26_v10 = vld [vmem:[%s241_s1] sm:$0x3] }
  0x15   :  { %56 = vperm.xlu1 %131, %v27_v2   ;;  %39 = vperm.xlu0 %130, %v27_v2   ;;  %v30_v7 = vand.u32 127, %v29_v6  ;;  %s191_s1 = smov [#allocation5]  }
  0x16   :  { %s110_s24 = sshll.u32 %s191_s1, 4  ;;  %s111_s24 = int_to_ptr.vmem [resolvable:$true] %s110_s24 }
  0x17   :  { %vm49_vm0 = vcmp.ge.s32.totalorder %v30_v7, 32  ;;  %vm50_vm1 = vcmp.lt.s32.totalorder %v30_v7, 64  ;;  %vm67_vm2 = vcmp.ge.s32.totalorder %v30_v7, 64  ;;  %vm68_vm3 = vcmp.lt.s32.totalorder %v30_v7, 96  ;;  %s158_s25 = scalar_lea.vmem %s111_s24, 64  ;;  %p163_p9 = scmp.lt.s32.totalorder %s111_s24, %s111_s24 }
  0x18   :  { %vm51_vm4 = vmand %vm49_vm0, %vm50_vm1  ;;  %vm32_vm5 = vcmp.lt.s32.totalorder %v30_v7, 32  ;;  %vm85_vm7 = vcmp.ge.s32.totalorder %v30_v7, 96  ;;  %p159_p8 = scmp.ne.s32.totalorder %s111_s24, %s158_s25  ;;  %p164_p10 = scmp.lt.s32.totalorder %s158_s25, %s158_s25 }
  0x19   :  { %60 = vperm.xlu1 %131, %v28_v3   ;;  %44 = vperm.xlu0 %130, %v28_v3   ;;  %vm69_vm6 = vmand %vm67_vm2, %vm68_vm3  ;;  %v54_v13 = vsel %vm51_vm4, %v26_v10, 0.0  ;;  %v36_v14 = vsel %vm32_vm5, %v26_v10, 0.0  ;;  %v90_v24 = vsel %vm85_vm7, %v26_v10, 0.0 }
  0x1a   :  { %v72_v15 = vsel %vm69_vm6, %v26_v10, 0.0  ;;  %p165_p11 = por %p164_p10, %p163_p9 }
  0x1c   :  { %p166_p12 = pnand %p165_p11, %p159_p8 }
  0x1d   :  { %133 = vset.pattern.permute.xlu1 %v189_v4  ;;  %132 = vset.pattern.permute.xlu0 %v189_v4 }
  0x1e   :  { %78 = vperm.xlu1 %133, %v28_v3   ;;  %74 = vperm.xlu0 %132, %v27_v2  }
  0x22   :  { %134 = vset.pattern.permute.xlu1 %v190_v5  ;;  %135 = vset.pattern.permute.xlu0 %v190_v5 }
  0x23   :  { %92 = vperm.xlu1 %134, %v27_v2   ;;  %96 = vperm.xlu0 %135, %v28_v3  }
  0x94   :  { %v57_v8 = vpop.permute.xlu1 %56  ;;  %v40_v9 = vpop.permute.xlu0 %39 }
  0x95   :  { %v63_v16 = vmul.f32 %v57_v8, %v54_v13  ;;  %v47_v17 = vmul.f32 %v40_v9, %v36_v14 }
  0x97   :  { %v65_v25 = vadd.f32 %v63_v16, %v47_v17 }
  0x98   :  { %v61_v11 = vpop.permute.xlu1 %60  ;;  %v45_v12 = vpop.permute.xlu0 %44 }
  0x99   :  { %v64_v18 = vmul.f32 %v61_v11, %v54_v13  ;;  %v48_v19 = vmul.f32 %v45_v12, %v36_v14 }
  0x9b   :  { %v66_v26 = vadd.f32 %v64_v18, %v48_v19 }
  0x9d   :  { %v79_v20 = vpop.permute.xlu1 %78  ;;  %v75_v21 = vpop.permute.xlu0 %74 }
  0x9e   :  { %v82_v22 = vmul.f32 %v79_v20, %v72_v15  ;;  %v81_v23 = vmul.f32 %v75_v21, %v72_v15 }
  0xa0   :  { %v84_v29 = vadd.f32 %v82_v22, %v66_v26  ;;  %v83_v30 = vadd.f32 %v81_v23, %v65_v25 }
  0xa2   :  { %v93_v27 = vpop.permute.xlu1 %92  ;;  %v97_v28 = vpop.permute.xlu0 %96 }
  0xa3   :  { %v99_v31 = vmul.f32 %v93_v27, %v90_v24  ;;  %v100_v32 = vmul.f32 %v97_v28, %v90_v24 }
  0xa5   :  { %v101_v33 = vadd.f32 %v99_v31, %v83_v30  ;;  %v102_v34 = vadd.f32 %v100_v32, %v84_v29 }
  0xa7   :  { %103 = vst [vmem:[#allocation5] sm:$0x3] %v101_v33  ;;  %104 = vst [vmem:[#allocation5 + $0x2] sm:$0x3] %v102_v34 }
  0xa8   :  { %169 = shalt.err (!%p166_p12)
}
  0xa9   :  { %s170_s28 = scalar_lea.hbm %s242_s2, 64 }
  0xaa   :  { %p171_p13 = scmp.ne.s32.totalorder %s242_s2, %s170_s28  ;;  %p174_p0 = scmp.lt.u32.totalorder %s170_s28, %s242_s2 }
  0xac   :  { %p176_p1 = pnand %p174_p0, %p171_p13 }
  0xae   :  { %179 = shalt.err (!%p176_p1)
}
  0xaf   :  { %116 = dma.vmem_to_hbm [thread:$0]  %s111_s24, 64, %s242_s2, [#allocation4], %s185_s19, %s185_s19, %s186_s20  }
  0xb0   :  { %182 = dma.done.wait [#allocation4], 64  }
  0xb1   :  { %183 = vsyncadd [#allocation4], 4294967232 }
  0xb2   :  { %120 = vsyncpa [#allocation3], 1 }
  0xb3   :  { %121 = vsyncpa [#allocation4], 1 }

// kernel: tpu_custom_call.1
= control target key start
LH: loop header
LB: loop body
LE: loop exit
PB: predicated region body
PF: predicated region fallthrough
CT: control target
= control target key end

     0   :  { %7 = vsyncpa [#allocation3], 0  ;;  %s240_s0 = inlined_call_operand.hbm [shape: f32[2,2,4], index: 0, kind: input, shape index: {}]   ;;  %s241_s1 = inlined_call_operand.vmem [shape: f32[2,128], index: 1, kind: input, shape index: {}]   ;;  %s242_s2 = inlined_call_operand.hbm [shape: f32[2,2,128], index: 2, kind: output, shape index: {}]  }
   0x1   :  { %8 = vsyncpa [#allocation4], 0  ;;  %s184_s9 = smov [#allocation2]   ;;  %s136_s13 = scalar_lea.hbm %s240_s0, 64 }
   0x2   :  { %s14_s10 = sshll.u32 %s184_s9, 4  ;;  %p137_p0 = scmp.ne.s32.totalorder %s240_s0, %s136_s13  ;;  %s15_s10 = int_to_ptr.vmem [resolvable:$true] %s14_s10 }
   0x3   :  { %p140_p1 = scmp.lt.u32.totalorder %s136_s13, %s240_s0 }
   0x5   :  { %p142_p2 = pnand %p140_p1, %p137_p0 }
   0x7   :  { %145 = shalt.err (!%p142_p2)
}
   0x8   :  { %s146_s18 = scalar_lea.vmem %s15_s10, 64  ;;  %p151_p4 = scmp.lt.s32.totalorder %s15_s10, %s15_s10 }
   0x9   :  { %p147_p3 = scmp.ne.s32.totalorder %s15_s10, %s146_s18  ;;  %p152_p5 = scmp.lt.s32.totalorder %s146_s18, %s146_s18 }
   0xb   :  { %p153_p6 = por %p152_p5, %p151_p4 }
   0xd   :  { %p154_p7 = pnand %p153_p6, %p147_p3 }
   0xf   :  { %157 = shalt.err (!%p154_p7)
}
  0x10   :  { %s185_s19 = smov 32   ;;  %s186_s20 = smov 2  }
  0x11   :  { %20 = dma.hbm_to_vmem [thread:$0]  %s240_s0, 64, %s15_s10, [#allocation3], %s185_s19, %s185_s19, %s186_s20  }
  0x12   :  { %180 = dma.done.wait [#allocation3], 64  }
  0x13   :  { %181 = vsyncadd [#allocation3], 4294967232  ;;  %v187_v0 = vmov 1   ;;  %v188_v1 = vmov 0   ;;  %v27_v2 = vld [vmem:[#allocation2] sm:$0x3]  ;;  %v29_v6 = vlaneseq }
  0x14   :  { %131 = vset.pattern.permute.xlu1 %v187_v0  ;;  %130 = vset.pattern.permute.xlu0 %v188_v1  ;;  %v28_v3 = vld [vmem:[#allocation2 + $0x2] sm:$0x3]  ;;  %v189_v4 = vmov 2   ;;  %v190_v5 = vmov 3   ;;  %v26_v10 = vld [vmem:[%s241_s1] sm:$0x3] }
  0x15   :  { %56 = vperm.xlu1 %131, %v27_v2   ;;  %39 = vperm.xlu0 %130, %v27_v2   ;;  %v30_v7 = vand.u32 127, %v29_v6  ;;  %s191_s1 = smov [#allocation5]  }
  0x16   :  { %s110_s24 = sshll.u32 %s191_s1, 4  ;;  %s111_s24 = int_to_ptr.vmem [resolvable:$true] %s110_s24 }
  0x17   :  { %vm49_vm0 = vcmp.ge.s32.totalorder %v30_v7, 32  ;;  %vm50_vm1 = vcmp.lt.s32.totalorder %v30_v7, 64  ;;  %vm67_vm2 = vcmp.ge.s32.totalorder %v30_v7, 64  ;;  %vm68_vm3 = vcmp.lt.s32.totalorder %v30_v7, 96  ;;  %s158_s25 = scalar_lea.vmem %s111_s24, 64  ;;  %p163_p9 = scmp.lt.s32.totalorder %s111_s24, %s111_s24 }
  0x18   :  { %vm51_vm4 = vmand %vm49_vm0, %vm50_vm1  ;;  %vm32_vm5 = vcmp.lt.s32.totalorder %v30_v7, 32  ;;  %vm85_vm7 = vcmp.ge.s32.totalorder %v30_v7, 96  ;;  %p159_p8 = scmp.ne.s32.totalorder %s111_s24, %s158_s25  ;;  %p164_p10 = scmp.lt.s32.totalorder %s158_s25, %s158_s25 }
  0x19   :  { %60 = vperm.xlu1 %131, %v28_v3   ;;  %44 = vperm.xlu0 %130, %v28_v3   ;;  %vm69_vm6 = vmand %vm67_vm2, %vm68_vm3  ;;  %v54_v13 = vsel %vm51_vm4, %v26_v10, 0.0  ;;  %v36_v14 = vsel %vm32_vm5, %v26_v10, 0.0  ;;  %v90_v24 = vsel %vm85_vm7, %v26_v10, 0.0 }
  0x1a   :  { %v72_v15 = vsel %vm69_vm6, %v26_v10, 0.0  ;;  %p165_p11 = por %p164_p10, %p163_p9 }
  0x1c   :  { %p166_p12 = pnand %p165_p11, %p159_p8 }
  0x1d   :  { %133 = vset.pattern.permute.xlu1 %v189_v4  ;;  %132 = vset.pattern.permute.xlu0 %v189_v4 }
  0x1e   :  { %78 = vperm.xlu1 %133, %v28_v3   ;;  %74 = vperm.xlu0 %132, %v27_v2  }
  0x22   :  { %134 = vset.pattern.permute.xlu1 %v190_v5  ;;  %135 = vset.pattern.permute.xlu0 %v190_v5 }
  0x23   :  { %92 = vperm.xlu1 %134, %v27_v2   ;;  %96 = vperm.xlu0 %135, %v28_v3  }
  0x94   :  { %v57_v8 = vpop.permute.xlu1 %56  ;;  %v40_v9 = vpop.permute.xlu0 %39 }
  0x95   :  { %v63_v16 = vmul.f32 %v57_v8, %v54_v13  ;;  %v47_v17 = vmul.f32 %v40_v9, %v36_v14 }
  0x97   :  { %v65_v25 = vadd.f32 %v63_v16, %v47_v17 }
  0x98   :  { %v61_v11 = vpop.permute.xlu1 %60  ;;  %v45_v12 = vpop.permute.xlu0 %44 }
  0x99   :  { %v64_v18 = vmul.f32 %v61_v11, %v54_v13  ;;  %v48_v19 = vmul.f32 %v45_v12, %v36_v14 }
  0x9b   :  { %v66_v26 = vadd.f32 %v64_v18, %v48_v19 }
  0x9d   :  { %v79_v20 = vpop.permute.xlu1 %78  ;;  %v75_v21 = vpop.permute.xlu0 %74 }
  0x9e   :  { %v82_v22 = vmul.f32 %v79_v20, %v72_v15  ;;  %v81_v23 = vmul.f32 %v75_v21, %v72_v15 }
  0xa0   :  { %v84_v29 = vadd.f32 %v82_v22, %v66_v26  ;;  %v83_v30 = vadd.f32 %v81_v23, %v65_v25 }
  0xa2   :  { %v93_v27 = vpop.permute.xlu1 %92  ;;  %v97_v28 = vpop.permute.xlu0 %96 }
  0xa3   :  { %v99_v31 = vmul.f32 %v93_v27, %v90_v24  ;;  %v100_v32 = vmul.f32 %v97_v28, %v90_v24 }
  0xa5   :  { %v101_v33 = vadd.f32 %v99_v31, %v83_v30  ;;  %v102_v34 = vadd.f32 %v100_v32, %v84_v29 }
  0xa7   :  { %103 = vst [vmem:[#allocation5] sm:$0x3] %v101_v33  ;;  %104 = vst [vmem:[#allocation5 + $0x2] sm:$0x3] %v102_v34 }
  0xa8   :  { %169 = shalt.err (!%p166_p12)
}
  0xa9   :  { %s170_s28 = scalar_lea.hbm %s242_s2, 64 }
  0xaa   :  { %p171_p13 = scmp.ne.s32.totalorder %s242_s2, %s170_s28  ;;  %p174_p0 = scmp.lt.u32.totalorder %s170_s28, %s242_s2 }
  0xac   :  { %p176_p1 = pnand %p174_p0, %p171_p13 }
  0xae   :  { %179 = shalt.err (!%p176_p1)
}
  0xaf   :  { %116 = dma.vmem_to_hbm [thread:$0]  %s111_s24, 64, %s242_s2, [#allocation4], %s185_s19, %s185_s19, %s186_s20  }
  0xb0   :  { %182 = dma.done.wait [#allocation4], 64  }
  0xb1   :  { %183 = vsyncadd [#allocation4], 4294967232 }
  0xb2   :  { %120 = vsyncpa [#allocation3], 1 }
  0xb3   :  { %121 = vsyncpa [#allocation4], 1 }

</bundles_post_ra>
